<compile_context>
chip_gen: v5e
topology: v5e:2x2
jax: 0.10.0
libtpu: 0.0.40
codegen_flags: <defaults>
</compile_context>

<pallas_src>
import functools

import jax
import jax.numpy as jnp
from jax.experimental import pallas as pl
from jax.experimental.pallas import tpu as pltpu


def phi_x_kernel(x_ref, w_ref, b_ref, o_ref):
    """One (tm, tn) output tile; grid = (M-tiles, N-tiles, K-tiles), K last."""
    k = pl.program_id(2)

    # x_ref: (tm, tk) bf16; w_ref: (tk, tn) bf16 (K-major) -> plain MXU matmul,
    # f32 accumulation.
    part = jnp.dot(x_ref[...], w_ref[...], preferred_element_type=jnp.float32)

    @pl.when(k == 0)
    def _():
        o_ref[...] = part          # first K step: overwrite (no zero-init pass)

    @pl.when(k != 0)
    def _():
        o_ref[...] += part         # accumulate in the resident f32 output tile

    @pl.when(k == pl.num_programs(2) - 1)
    def _():
        # Bias add + ReLU once per output tile, off the K inner loop.
        o_ref[...] = jnp.maximum(o_ref[...] + b_ref[...], 0.0)


def _round_up(x, m):
    return ((x + m - 1) // m) * m


def _pick_tile(dim, cap, align):
    """Largest multiple of `align` that divides `dim` and is <= cap (dim % align == 0)."""
    t = min(cap, dim)
    t -= t % align
    t = max(t, align)
    while dim % t:
        t -= align
    return t


@functools.partial(jax.jit, static_argnames=("tm", "tn", "tk"))
def phi_x(x, weight, bias, *, tm=None, tn=None, tk=None):
    """x: (B, x_dim) f32; weight: (h_dim, x_dim) f32 (PyTorch layout); bias: (h_dim,)."""
    B, x_dim = x.shape
    h_dim = weight.shape[0]

    # Minimal alignment padding only: M -> 8 (sublanes), N/K -> 128 (lanes).
    Mp = _round_up(B, 8)
    Np = _round_up(h_dim, 128)
    Kp = _round_up(x_dim, 128)

    # Tiles: divisors of the (minimally) padded dims, clamped to large-but-safe
    # caps. bf16 tiles at the caps are ~6 MiB double-buffered -> fits every
    # generation's scoped VMEM comfortably.
    if tm is None:
        tm = _pick_tile(Mp, 512, 8)
    if tn is None:
        tn = _pick_tile(Np, 512, 128)
    if tk is None:
        tk = _pick_tile(Kp, 1024, 128)

    # v7x shards the "parallel" grid axes across its 2 TensorCores: make sure
    # there are >=2 parallel blocks whenever the problem allows it. Prefer
    # splitting M (x tile refetch cost is zero; W is small and cheap to refetch).
    if (Mp // tm) * (Np // tn) < 2:
        if Mp // 8 >= 2:
            tm = _pick_tile(Mp, max(8, Mp // 2), 8)
        elif Np // 128 >= 2:
            tn = _pick_tile(Np, max(128, Np // 2), 128)

    grid = (Mp // tm, Np // tn, Kp // tk)

    # bf16 operands (padded K contributes exactly 0 to the dot; padded M/N
    # rows/cols are sliced off below). W is transposed to K-major once here —
    # fused with the bf16 cast/pad copy we already make, so no extra HBM pass.
    x_p = x if (Mp == B and Kp == x_dim) else jnp.pad(
        x, ((0, Mp - B), (0, Kp - x_dim)))
    x_p = x_p.astype(jnp.bfloat16)

    w_t = weight.T  # (x_dim, h_dim), K-major for the MXU
    if (Kp, Np) != (x_dim, h_dim):
        w_t = jnp.pad(w_t, ((0, Kp - x_dim), (0, Np - h_dim)))
    w_p = w_t.astype(jnp.bfloat16)

    b_p = bias if Np == h_dim else jnp.pad(bias, (0, Np - h_dim))
    b_p = b_p.reshape(1, Np).astype(jnp.float32)

    # Scoped VMEM: double-buffered bf16 input tiles + f32 output tile + bias,
    # x2 headroom, clamped to [16 MiB, 48 MiB] (48 MiB leaves headroom inside
    # v7x's 64 MiB physical VMEM per TC).
    tile_bytes = (2 * tm * tk * 2      # x tiles (bf16, double-buffered)
                  + 2 * tk * tn * 2    # W tiles (bf16, double-buffered)
                  + 2 * tm * tn * 4    # output tiles (f32)
                  + 2 * tn * 4)        # bias tile
    vmem_limit = int(min(48 * 1024 * 1024, max(16 * 1024 * 1024, 2 * tile_bytes)))

    out_p = pl.pallas_call(
        phi_x_kernel,
        out_shape=jax.ShapeDtypeStruct((Mp, Np), jnp.float32),
        grid_spec=pltpu.PrefetchScalarGridSpec(
            num_scalar_prefetch=0,
            grid=grid,
            in_specs=[
                pl.BlockSpec((tm, tk), lambda i, j, k: (i, k)),   # x tile
                pl.BlockSpec((tk, tn), lambda i, j, k: (k, j)),   # W tile (K-major)
                pl.BlockSpec((1, tn), lambda i, j, k: (0, j)),    # bias tile (N only)
            ],
            out_specs=pl.BlockSpec((tm, tn), lambda i, j, k: (i, j)),
        ),
        compiler_params=pltpu.CompilerParams(
            dimension_semantics=("parallel", "parallel", "arbitrary"),
            vmem_limit_bytes=vmem_limit,
        ),
    )(x_p, w_p, b_p)

    return out_p[:B, :h_dim]


def _ref_f32(x, w, b):
    return jnp.maximum(x @ w.T + b, 0.0)


def _ref_bf16(x, w, b):
    y = jnp.dot(x.astype(jnp.bfloat16), w.T.astype(jnp.bfloat16),
                preferred_element_type=jnp.float32) + b
    return jnp.maximum(y, 0.0)


if __name__ == "__main__":
    key = jax.random.PRNGKey(0)

    # --- Small shapes consistent with Phi_x(x_dim, h_dim) ---
    # NOTE: at this size a standalone kernel is launch-overhead dominated;
    # it exists here for correctness. Real use should batch / use bigger dims.
    B, x_dim, h_dim = 2, 16, 32
    kx, kw, kb = jax.random.split(key, 3)
    x = jax.random.normal(kx, (B, x_dim), dtype=jnp.float32)
    weight = jax.random.normal(kw, (h_dim, x_dim), dtype=jnp.float32) * 0.1
    bias = jax.random.normal(kb, (h_dim,), dtype=jnp.float32) * 0.1

    out = jax.block_until_ready(phi_x(x, weight, bias))
    assert out.shape == (B, h_dim)
    # Tight check vs a bf16-quantized reference (same precision recipe) ...
    assert jnp.allclose(out, _ref_bf16(x, weight, bias), atol=1e-3, rtol=1e-3)
    # ... and a looser semantic check vs the exact f32 reference.
    assert jnp.allclose(out, _ref_f32(x, weight, bias), atol=5e-2, rtol=5e-2)

    # --- Larger shape to exercise multi-tile M/K grid, K-accumulation and the
    # --- dual-TensorCore M-split path (grid becomes (2, 1, 2) here).
    B2, x_dim2, h_dim2 = 256, 1280, 384
    kx2, kw2, kb2 = jax.random.split(jax.random.PRNGKey(1), 3)
    x2 = jax.random.normal(kx2, (B2, x_dim2), dtype=jnp.float32)
    w2 = jax.random.normal(kw2, (h_dim2, x_dim2), dtype=jnp.float32) * 0.05
    b2 = jax.random.normal(kb2, (h_dim2,), dtype=jnp.float32) * 0.05

    out2 = jax.block_until_ready(phi_x(x2, w2, b2))
    assert out2.shape == (B2, h_dim2)
    assert jnp.allclose(out2, _ref_bf16(x2, w2, b2), atol=1e-3, rtol=1e-3)
    assert jnp.allclose(out2, _ref_f32(x2, w2, b2), atol=5e-2, rtol=5e-2)

    print("KERNEL_OK")
</pallas_src>

<mosaic_0001>
module attributes {stable_mosaic.version = 11 : i64} {
  func.func @phi_x_kernel(%arg0: i32, %arg1: i32, %arg2: i32, %arg3: memref<8x128xbf16, #tpu.memory_space<vmem>>, %arg4: memref<128x128xbf16, #tpu.memory_space<vmem>>, %arg5: memref<1x128xf32, #tpu.memory_space<vmem>>, %arg6: memref<8x128xf32, #tpu.memory_space<vmem>>) attributes {dimension_semantics = [#tpu.dimension_semantics<parallel>, #tpu.dimension_semantics<parallel>, #tpu.dimension_semantics<arbitrary>], iteration_bounds = array<i64: 1, 1, 1>, scalar_prefetch = 0 : i64, scratch_operands = 0 : i64, tpu.core_type = #tpu.core_type<tc>, window_params = [{transform_indices = @transform_0, window_bounds = array<i64: 8, 128>}, {transform_indices = @transform_1, window_bounds = array<i64: 128, 128>}, {transform_indices = @transform_2, window_bounds = array<i64: 1, 128>}, {transform_indices = @transform_3, window_bounds = array<i64: 8, 128>}]} {
    %c0 = arith.constant 0 : index
    %c0_0 = arith.constant 0 : index
    %0 = vector.load %arg3[%c0, %c0_0] : memref<8x128xbf16, #tpu.memory_space<vmem>>, vector<8x128xbf16>
    %c0_1 = arith.constant 0 : index
    %c0_2 = arith.constant 0 : index
    %1 = vector.load %arg4[%c0_1, %c0_2] : memref<128x128xbf16, #tpu.memory_space<vmem>>, vector<128x128xbf16>
    %cst = arith.constant dense<0.000000e+00> : vector<8x128xf32>
    %2 = tpu.matmul %0, %1, %cst {dimension_numbers = #tpu.dot_dimension_numbers<[1], [0], [0], [1], [0, 0, 1, 1], [], []>} : vector<8x128xbf16>, vector<128x128xbf16>, vector<8x128xf32> -> vector<8x128xf32>
    %c0_i32 = arith.constant 0 : i32
    %3 = arith.cmpi eq, %arg2, %c0_i32 : i32
    %4 = arith.extui %3 : i1 to i32
    %c0_i32_3 = arith.constant 0 : i32
    %5 = arith.cmpi ne, %4, %c0_i32_3 : i32
    scf.if %5 {
      %c0_8 = arith.constant 0 : index
      %c0_9 = arith.constant 0 : index
      %12 = vector.load %arg6[%c0_8, %c0_9] : memref<8x128xf32, #tpu.memory_space<vmem>>, vector<8x128xf32>
      tpu.vector_store %arg6[%c0_8, %c0_9], %2 {strides = array<i32>} : memref<8x128xf32, #tpu.memory_space<vmem>>, vector<8x128xf32>,
    } else {
    }
    %c0_i32_4 = arith.constant 0 : i32
    %6 = arith.cmpi ne, %arg2, %c0_i32_4 : i32
    %7 = arith.extui %6 : i1 to i32
    %c0_i32_5 = arith.constant 0 : i32
    %8 = arith.cmpi ne, %7, %c0_i32_5 : i32
    scf.if %8 {
      %c0_8 = arith.constant 0 : index
      %c0_9 = arith.constant 0 : index
      %12 = vector.load %arg6[%c0_8, %c0_9] : memref<8x128xf32, #tpu.memory_space<vmem>>, vector<8x128xf32>
      %13 = arith.addf %12, %2 : vector<8x128xf32>
      %c0_10 = arith.constant 0 : index
      %c0_11 = arith.constant 0 : index
      %14 = vector.load %arg6[%c0_10, %c0_11] : memref<8x128xf32, #tpu.memory_space<vmem>>, vector<8x128xf32>
      tpu.vector_store %arg6[%c0_10, %c0_11], %13 {strides = array<i32>} : memref<8x128xf32, #tpu.memory_space<vmem>>, vector<8x128xf32>,
    } else {
    }
    %c0_i32_6 = arith.constant 0 : i32
    %9 = arith.cmpi eq, %arg2, %c0_i32_6 : i32
    %10 = arith.extui %9 : i1 to i32
    %c0_i32_7 = arith.constant 0 : i32
    %11 = arith.cmpi ne, %10, %c0_i32_7 : i32
    scf.if %11 {
      %c0_8 = arith.constant 0 : index
      %c0_9 = arith.constant 0 : index
      %12 = vector.load %arg6[%c0_8, %c0_9] : memref<8x128xf32, #tpu.memory_space<vmem>>, vector<8x128xf32>
      %c0_10 = arith.constant 0 : index
      %c0_11 = arith.constant 0 : index
      %13 = vector.load %arg5[%c0_10, %c0_11] : memref<1x128xf32, #tpu.memory_space<vmem>>, vector<1x128xf32>
      %14 = vector.broadcast %13 : vector<1x128xf32> to vector<8x128xf32>
      %15 = arith.addf %12, %14 : vector<8x128xf32>
      %cst_12 = arith.constant 0.000000e+00 : f32
      %16 = vector.broadcast %cst_12 : f32 to vector<8x128xf32>
      %17 = arith.maximumf %15, %16 : vector<8x128xf32>
      %c0_13 = arith.constant 0 : index
      %c0_14 = arith.constant 0 : index
      %18 = vector.load %arg6[%c0_13, %c0_14] : memref<8x128xf32, #tpu.memory_space<vmem>>, vector<8x128xf32>
      tpu.vector_store %arg6[%c0_13, %c0_14], %17 {strides = array<i32>} : memref<8x128xf32, #tpu.memory_space<vmem>>, vector<8x128xf32>,
    } else {
    }
    return
  }
  func.func @transform_0(%arg0: i32, %arg1: i32, %arg2: i32) -> (i32, i32) {
    %c0_i32 = arith.constant 0 : i32
    return %arg0, %arg2 : i32, i32
  }
  func.func @transform_1(%arg0: i32, %arg1: i32, %arg2: i32) -> (i32, i32) {
    %c0_i32 = arith.constant 0 : i32
    return %arg2, %arg1 : i32, i32
  }
  func.func @transform_2(%arg0: i32, %arg1: i32, %arg2: i32) -> (i32, i32) {
    %c0_i32 = arith.constant 0 : i32
    %c0_i32_0 = arith.constant 0 : i32
    return %c0_i32, %arg1 : i32, i32
  }
  func.func @transform_3(%arg0: i32, %arg1: i32, %arg2: i32) -> (i32, i32) {
    %c0_i32 = arith.constant 0 : i32
    return %arg0, %arg1 : i32, i32
  }
}

</mosaic_0001>

<bundles_post_ra>
// kernel: phi_x.1
= control target key start
LH: loop header
LB: loop body
LE: loop exit
PB: predicated region body
PF: predicated region fallthrough
CT: control target
= control target key end

     0   :  { %s213_s1 = inlined_call_operand.vmem [shape: bf16[128,128], index: 1, kind: input, shape index: {}]   ;;  %s214_s2 = inlined_call_operand.vmem [shape: f32[1,128], index: 2, kind: input, shape index: {}]   ;;  %s215_s0 = inlined_call_operand.vmem [shape: bf16[8,128], index: 0, kind: input, shape index: {}]   ;;  %s216_s3 = inlined_call_operand.vmem [shape: f32[8,128], index: 3, kind: output, shape index: {}]  }
   0x1   :  { %v158_v0 = vld [vmem:[%s213_s1 + $0x38] sm:$0xff]  ;;  %v157_v1 = vld [vmem:[%s213_s1 + $0x30] sm:$0xff]  ;;  %v156_v2 = vld [vmem:[%s213_s1 + $0x28] sm:$0xff] }
   0x2   :  { %79 = vmatpush.bf16.msra.mxu0 %v158_v0  ;;  %v155_v3 = vld [vmem:[%s213_s1 + $0x20] sm:$0xff]  ;;  %v154_v4 = vld [vmem:[%s213_s1 + $0x18] sm:$0xff]  ;;  %v153_v5 = vld [vmem:[%s213_s1 + $0x10] sm:$0xff] }
   0x3   :  { %v152_v6 = vld [vmem:[%s213_s1 + $0x8] sm:$0xff]  ;;  %v151_v7 = vld [vmem:[%s213_s1] sm:$0xff] }
   0x4   :  { %v14_v8 = vld [vmem:[%s215_s0] sm:$0xf] }
   0x5   :  { %v159_v9 = vld [vmem:[%s214_s2] ss:$0 sm:$0xff] }
   0x6   :  { %80 = vmatpush.bf16.msra.mxu0 %v157_v1 }
   0xa   :  { %81 = vmatpush.bf16.msra.mxu0 %v156_v2 }
   0xe   :  { %82 = vmatpush.bf16.msra.mxu0 %v155_v3 }
  0x12   :  { %83 = vmatpush.bf16.msra.mxu0 %v154_v4 }
  0x16   :  { %84 = vmatpush.bf16.msra.mxu0 %v153_v5 }
  0x1a   :  { %85 = vmatpush.bf16.msra.mxu0 %v152_v6 }
  0x1e   :  { %86 = vmatpush.bf16.msra.mxu0 %v151_v7 }
  0x21   :  { %87 = vmatmul.bf16.vlgmr.msra.gmra.mxu0 %v14_v8 }
  0x9e   :  { %v88_v10 = vpop.f32.mrf.mxu0 }
  0x9f   :  { %v112_v11 = vadd.f32 %v159_v9, %v88_v10 }
  0xa1   :  { %v113_v12 = vmax.f32 %v112_v11, 0.0 }
  0xa3   :  { %114 = vst [vmem:[%s216_s3] sm:$0xff] %v113_v12 }
  0xa6   :  { %v90_v13 = vpop.f32.mrf.mxu0 }

</bundles_post_ra>
